<compile_context>
chip_gen: v7x
topology: tpu7x:2x2x1
jax: 0.10.0
libtpu: 0.0.40
codegen_flags: <defaults>
</compile_context>

<pallas_src>
import math

import jax
import jax.numpy as jnp
from jax.experimental import pallas as pl
from jax.experimental.pallas import tpu as pltpu


_MAX_DMA_CHUNKS = 4  # a few chunks in flight -> multiple DMA engines used


def _make_unwrap_dma_kernel(bounds):
    """Build a kernel that copies row-chunks [bounds[c], bounds[c+1]) via DMA."""
    chunks = len(bounds) - 1

    def kernel(x_hbm, o_hbm, sems):
        # Issue all chunk copies (HBM -> HBM), then wait for completion.
        for c in range(chunks):
            lo = bounds[c]
            sz = bounds[c + 1] - bounds[c]
            pltpu.make_async_copy(
                x_hbm.at[pl.ds(lo, sz)], o_hbm.at[pl.ds(lo, sz)], sems.at[c]
            ).start()
        for c in range(chunks):
            lo = bounds[c]
            sz = bounds[c + 1] - bounds[c]
            pltpu.make_async_copy(
                x_hbm.at[pl.ds(lo, sz)], o_hbm.at[pl.ds(lo, sz)], sems.at[c]
            ).wait()

    return kernel


def unwrap(x):
    """Flatten all dims except the leading (batch) dim, via a Pallas kernel."""
    n = x.shape[0]
    flat = math.prod(x.shape[1:]) if x.ndim > 1 else 1

    # Metadata-only flatten in HBM (free). The kernel is a pure byte copy.
    x2 = jnp.reshape(x, (n, flat))

    # Split the rows into a few chunks so several DMA engines stream
    # concurrently.  Chunk boundaries are static (computed at trace time);
    # each chunk holds at least one row because chunks <= n.
    chunks = max(1, min(_MAX_DMA_CHUNKS, n))
    bounds = tuple((c * n) // chunks for c in range(chunks + 1))

    dtype_bytes = jnp.dtype(x.dtype).itemsize

    return pl.pallas_call(
        _make_unwrap_dma_kernel(bounds),
        out_shape=jax.ShapeDtypeStruct((n, flat), x.dtype),
        in_specs=[pl.BlockSpec(memory_space=pl.ANY)],
        out_specs=pl.BlockSpec(memory_space=pl.ANY),
        scratch_shapes=[pltpu.SemaphoreType.DMA((chunks,))],
        cost_estimate=pl.CostEstimate(
            flops=0,
            transcendentals=0,
            bytes_accessed=2 * n * flat * dtype_bytes,
        ),
    )(x2)


if __name__ == "__main__":
    key = jax.random.PRNGKey(0)
    # Small NCHW input consistent with a LeNet-style feature map.
    x = jax.random.normal(key, (2, 4, 16, 16), dtype=jnp.float32)

    out = unwrap(x)
    out = jax.block_until_ready(out)

    # Reference semantics: torch's x.reshape(x.size(0), -1)
    ref = x.reshape(x.shape[0], -1)
    assert out.shape == (2, 4 * 16 * 16), out.shape
    assert out.dtype == x.dtype
    assert jnp.array_equal(out, ref), "mismatch vs reference flatten"

    print("KERNEL_OK")
</pallas_src>

<mosaic_0001>
module attributes {stable_mosaic.version = 11 : i64} {
  func.func @kernel(%arg0: memref<2x1024xf32, #tpu.memory_space<any>>, %arg1: memref<2x1024xf32, #tpu.memory_space<any>>, %arg2: memref<2x!tpu.dma_semaphore, #tpu.memory_space<semaphore_mem>>) attributes {dimension_semantics = [], scalar_prefetch = 0 : i64, scratch_operands = 1 : i64, tpu.core_type = #tpu.core_type<tc>} {
    %c0_i32 = arith.constant 0 : i32
    %c0_i32_0 = arith.constant 0 : i32
    %c0_i32_1 = arith.constant 0 : i32
    %0 = tpu.memref_slice %arg0[%c0_i32_0, %c0_i32_1] : memref<2x1024xf32, #tpu.memory_space<any>> -> memref<1x1024xf32, #tpu.memory_space<any>>
    %c0_i32_2 = arith.constant 0 : i32
    %c0_i32_3 = arith.constant 0 : i32
    %1 = tpu.memref_slice %arg1[%c0_i32_2, %c0_i32_3] : memref<2x1024xf32, #tpu.memory_space<any>> -> memref<1x1024xf32, #tpu.memory_space<any>>
    %2 = tpu.memref_slice %arg2[%c0_i32] : memref<2x!tpu.dma_semaphore, #tpu.memory_space<semaphore_mem>> -> memref<1x!tpu.dma_semaphore, #tpu.memory_space<semaphore_mem>>
    %3 = tpu.memref_squeeze %2 : memref<1x!tpu.dma_semaphore, #tpu.memory_space<semaphore_mem>> -> memref<!tpu.dma_semaphore, #tpu.memory_space<semaphore_mem>>
    tpu.enqueue_dma source(%0 : memref<1x1024xf32, #tpu.memory_space<any>>) target(%1 : memref<1x1024xf32, #tpu.memory_space<any>>) target_semaphore(%3 : memref<!tpu.dma_semaphore, #tpu.memory_space<semaphore_mem>>)
    %c1_i32 = arith.constant 1 : i32
    %c1_i32_4 = arith.constant 1 : i32
    %c0_i32_5 = arith.constant 0 : i32
    %4 = tpu.memref_slice %arg0[%c1_i32_4, %c0_i32_5] : memref<2x1024xf32, #tpu.memory_space<any>> -> memref<1x1024xf32, #tpu.memory_space<any>>
    %c1_i32_6 = arith.constant 1 : i32
    %c0_i32_7 = arith.constant 0 : i32
    %5 = tpu.memref_slice %arg1[%c1_i32_6, %c0_i32_7] : memref<2x1024xf32, #tpu.memory_space<any>> -> memref<1x1024xf32, #tpu.memory_space<any>>
    %6 = tpu.memref_slice %arg2[%c1_i32] : memref<2x!tpu.dma_semaphore, #tpu.memory_space<semaphore_mem>> -> memref<1x!tpu.dma_semaphore, #tpu.memory_space<semaphore_mem>>
    %7 = tpu.memref_squeeze %6 : memref<1x!tpu.dma_semaphore, #tpu.memory_space<semaphore_mem>> -> memref<!tpu.dma_semaphore, #tpu.memory_space<semaphore_mem>>
    tpu.enqueue_dma source(%4 : memref<1x1024xf32, #tpu.memory_space<any>>) target(%5 : memref<1x1024xf32, #tpu.memory_space<any>>) target_semaphore(%7 : memref<!tpu.dma_semaphore, #tpu.memory_space<semaphore_mem>>)
    %c0_i32_8 = arith.constant 0 : i32
    %c0_i32_9 = arith.constant 0 : i32
    %c0_i32_10 = arith.constant 0 : i32
    %8 = tpu.memref_slice %arg0[%c0_i32_9, %c0_i32_10] : memref<2x1024xf32, #tpu.memory_space<any>> -> memref<1x1024xf32, #tpu.memory_space<any>>
    %c0_i32_11 = arith.constant 0 : i32
    %c0_i32_12 = arith.constant 0 : i32
    %9 = tpu.memref_slice %arg1[%c0_i32_11, %c0_i32_12] : memref<2x1024xf32, #tpu.memory_space<any>> -> memref<1x1024xf32, #tpu.memory_space<any>>
    %10 = tpu.memref_slice %arg2[%c0_i32_8] : memref<2x!tpu.dma_semaphore, #tpu.memory_space<semaphore_mem>> -> memref<1x!tpu.dma_semaphore, #tpu.memory_space<semaphore_mem>>
    %11 = tpu.memref_squeeze %10 : memref<1x!tpu.dma_semaphore, #tpu.memory_space<semaphore_mem>> -> memref<!tpu.dma_semaphore, #tpu.memory_space<semaphore_mem>>
    tpu.wait_dma2 semaphore(%11 : memref<!tpu.dma_semaphore, #tpu.memory_space<semaphore_mem>>) src(%8 : memref<1x1024xf32, #tpu.memory_space<any>>) dst(%9 : memref<1x1024xf32, #tpu.memory_space<any>>)
    %c1_i32_13 = arith.constant 1 : i32
    %c1_i32_14 = arith.constant 1 : i32
    %c0_i32_15 = arith.constant 0 : i32
    %12 = tpu.memref_slice %arg0[%c1_i32_14, %c0_i32_15] : memref<2x1024xf32, #tpu.memory_space<any>> -> memref<1x1024xf32, #tpu.memory_space<any>>
    %c1_i32_16 = arith.constant 1 : i32
    %c0_i32_17 = arith.constant 0 : i32
    %13 = tpu.memref_slice %arg1[%c1_i32_16, %c0_i32_17] : memref<2x1024xf32, #tpu.memory_space<any>> -> memref<1x1024xf32, #tpu.memory_space<any>>
    %14 = tpu.memref_slice %arg2[%c1_i32_13] : memref<2x!tpu.dma_semaphore, #tpu.memory_space<semaphore_mem>> -> memref<1x!tpu.dma_semaphore, #tpu.memory_space<semaphore_mem>>
    %15 = tpu.memref_squeeze %14 : memref<1x!tpu.dma_semaphore, #tpu.memory_space<semaphore_mem>> -> memref<!tpu.dma_semaphore, #tpu.memory_space<semaphore_mem>>
    tpu.wait_dma2 semaphore(%15 : memref<!tpu.dma_semaphore, #tpu.memory_space<semaphore_mem>>) src(%12 : memref<1x1024xf32, #tpu.memory_space<any>>) dst(%13 : memref<1x1024xf32, #tpu.memory_space<any>>)
    return
  }
}

</mosaic_0001>

<bundles_post_ra>
// kernel: tpu_custom_call.1
= control target key start
LH: loop header
LB: loop body
LE: loop exit
PB: predicated region body
PF: predicated region fallthrough
CT: control target
= control target key end

     0   :  { %s78_s6 = smov 32   ;;  %s79_s7 = smov 1   ;;  %s107_s0 = inlined_call_operand.hbm [shape: f32[2,1024], index: 0, kind: input, shape index: {}]   ;;  %s108_s1 = inlined_call_operand.hbm [shape: f32[2,1024], index: 1, kind: output, shape index: {}]  }
   0x1   :  { %18 = sst [smem:[#allocation4]] %s78_s6  ;;  %s80_s8 = smov [#allocation2]  }
   0x2   :  { %20 = sst [smem:[#allocation4 + $0x1]] %s78_s6  ;;  %s81_s9 = smov [#allocation3]  }
   0x3   :  { %22 = sst [smem:[#allocation4 + $0x2]] %s79_s7  ;;  %s82_s10 = smov 0  }
   0x4   :  { %24 = dma.general %s107_s0, 128, %s108_s1, %s80_s8, %s81_s9, [#allocation4], %s82_s10, 0  }
   0x5   :  { %40 = sst [smem:[#allocation6]] %s78_s6  ;;  %s25_s17 = scalar_lea.hbm %s107_s0, 16 }
   0x6   :  { %42 = sst [smem:[#allocation6 + $0x1]] %s78_s6  ;;  %s26_s20 = scalar_lea.hbm %s108_s1, 16 }
   0x7   :  { %44 = sst [smem:[#allocation6 + $0x2]] %s79_s7  ;;  %s83_s21 = smov [#allocation2 + $0x1]  }
   0x8   :  { %s84_s22 = smov [#allocation5]  }
   0x9   :  { %46 = dma.general %s25_s17, 128, %s26_s20, %s83_s21, %s84_s22, [#allocation6], %s82_s10, 0  }
   0xa   :  { %74 = dma.done.wait [#allocation2], 128 }
   0xb   :  { %75 = vsyncadd [#allocation2], 4294967168 }
   0xc   :  { %76 = dma.done.wait [#allocation2 + $0x1], 128 }
   0xd   :  { %77 = vsyncadd [#allocation2 + $0x1], 4294967168 }
   0xe   :  { %52 = vsyncmov [#allocation2] }
  0x11   :  { %s53_s23 = vpop.sfrf %52 }
  0x12   :  { %p65_p0 = scmp.ne.s32.totalorder %s53_s23, 0 }
  0x14   :  { %57 = shalt.err (%p65_p0)  }
  0x15   :  { %59 = vsyncmov [#allocation2 + $0x1] }
  0x18   :  { %s60_s24 = vpop.sfrf %59 }
  0x19   :  { %p66_p1 = scmp.ne.s32.totalorder %s60_s24, 0 }
  0x1b   :  { %64 = shalt.err (%p66_p1)  }

</bundles_post_ra>
